<compile_context>
chip_gen: v5e
topology: v5e:2x2
jax: 0.10.0
libtpu: 0.0.40
codegen_flags: <defaults>
</compile_context>

<pallas_src>
import functools
import math

import jax
import jax.numpy as jnp
from jax.experimental import pallas as pl
from jax.experimental.pallas import tpu as pltpu

EPS = 1e-6                     # LayerNorm eps (added to std, torch-style)
NEG_INF = -1e18                # masked_fill value used by the reference
VMEM_LIMIT = 32 * 1024 * 1024  # explicit scoped-VMEM budget (safe on v5e..v7x)


# ----------------------------- tiling helpers -------------------------------

def _round_up(x, n):
    return ((x + n - 1) // n) * n


def _row_tiles(m, target=256):
    """Row tile tm (multiple of 8, <= target) and padded row count divisible by tm."""
    tm = min(_round_up(m, 8), max(8, (target // 8) * 8))
    m_pad = _round_up(m, tm)
    return tm, m_pad


def _pick_lane_tile(n, target=512):
    """Lane tile: full dim if not 128-aligned, else prefer 256-multiples (v6e/v7x MXU)."""
    if n < 128 or n % 128 != 0:
        return n
    for step in (256, 128):
        t = (min(target, n) // step) * step
        while t >= step:
            if n % t == 0:
                return t
            t -= step
    return n


def _pad_rows_to(x, m_pad):
    m = x.shape[0]
    if m_pad == m:
        return x
    return jnp.pad(x, ((0, m_pad - m), (0, 0)))


# ------------------------------ LayerNorm math -------------------------------

def _layernorm_rows(x, g, b):
    """Torch-style LN: unbiased std, eps added to std. x f32 (tm, D)."""
    d = x.shape[-1]
    mean = jnp.mean(x, axis=-1, keepdims=True)
    xc = x - mean
    var = jnp.sum(xc * xc, axis=-1, keepdims=True) / (d - 1)
    inv = pl.reciprocal(jnp.sqrt(var) + EPS, approx=True)
    return g.astype(jnp.float32) * xc * inv + b.astype(jnp.float32)


# ----------------------- fused LayerNorm + linear kernels ---------------------

def _ln_linear_kernel(x_ref, g_ref, b_ref, wt_ref, bias_ref, o_ref, xn_sc):
    j = pl.program_id(1)

    @pl.when(j == 0)
    def _():
        xn_sc[...] = _layernorm_rows(x_ref[...].astype(jnp.float32),
                                     g_ref[...], b_ref[...])

    o_ref[...] = (jnp.dot(xn_sc[...], wt_ref[...],
                          preferred_element_type=jnp.float32)
                  + bias_ref[...].astype(jnp.float32)).astype(o_ref.dtype)


def _ln_linear_xn_kernel(x_ref, g_ref, b_ref, wt_ref, bias_ref,
                         o_ref, xn_out_ref, xn_sc):
    j = pl.program_id(1)

    @pl.when(j == 0)
    def _():
        xn = _layernorm_rows(x_ref[...].astype(jnp.float32), g_ref[...], b_ref[...])
        xn_sc[...] = xn
        xn_out_ref[...] = xn.astype(xn_out_ref.dtype)

    o_ref[...] = (jnp.dot(xn_sc[...], wt_ref[...],
                          preferred_element_type=jnp.float32)
                  + bias_ref[...].astype(jnp.float32)).astype(o_ref.dtype)


def ln_linear(x2d, g, b, wt, bias, *, emit_xn=False, tm_target=256, tn_target=512):
    """y = LayerNorm(x2d) @ wt + bias. wt is pre-transposed (D, N). Optionally also
    returns the normalized activation (used for `all_input`)."""
    m, d = x2d.shape
    n = wt.shape[1]
    tm, m_pad = _row_tiles(m, tm_target)
    tn = _pick_lane_tile(n, tn_target)
    xp = _pad_rows_to(x2d, m_pad)
    grid = (m_pad // tm, n // tn)

    in_specs = [
        pl.BlockSpec((tm, d), lambda i, j: (i, 0)),
        pl.BlockSpec((1, d), lambda i, j: (0, 0)),
        pl.BlockSpec((1, d), lambda i, j: (0, 0)),
        pl.BlockSpec((d, tn), lambda i, j: (0, j)),
        pl.BlockSpec((1, tn), lambda i, j: (0, j)),
    ]
    if emit_xn:
        kernel = _ln_linear_xn_kernel
        out_shape = (jax.ShapeDtypeStruct((m_pad, n), x2d.dtype),
                     jax.ShapeDtypeStruct((m_pad, d), x2d.dtype))
        out_specs = (pl.BlockSpec((tm, tn), lambda i, j: (i, j)),
                     pl.BlockSpec((tm, d), lambda i, j: (i, 0)))
    else:
        kernel = _ln_linear_kernel
        out_shape = jax.ShapeDtypeStruct((m_pad, n), x2d.dtype)
        out_specs = pl.BlockSpec((tm, tn), lambda i, j: (i, j))

    res = pl.pallas_call(
        kernel,
        out_shape=out_shape,
        grid_spec=pltpu.PrefetchScalarGridSpec(
            num_scalar_prefetch=0,
            grid=grid,
            in_specs=in_specs,
            out_specs=out_specs,
            scratch_shapes=[pltpu.VMEM((tm, d), jnp.float32)],
        ),
        compiler_params=pltpu.CompilerParams(
            dimension_semantics=("parallel", "arbitrary"),
            vmem_limit_bytes=VMEM_LIMIT),
    )(xp, g, b, wt, bias)

    if emit_xn:
        y, xn = res
        return y[:m], xn[:m]
    return res[:m]


# -------------------- plain linear (x @ Wt + b [+ residual]) -----------------

def _linear_kernel(x_ref, wt_ref, b_ref, o_ref, acc_ref):
    k = pl.program_id(2)

    @pl.when(k == 0)
    def _():
        acc_ref[...] = jnp.zeros_like(acc_ref)

    acc_ref[...] += jnp.dot(x_ref[...], wt_ref[...],
                            preferred_element_type=jnp.float32)

    @pl.when(k == pl.num_programs(2) - 1)
    def _():
        o_ref[...] = (acc_ref[...] + b_ref[...].astype(jnp.float32)).astype(o_ref.dtype)


def _linear_res_kernel(x_ref, wt_ref, b_ref, r_ref, o_ref, acc_ref):
    k = pl.program_id(2)

    @pl.when(k == 0)
    def _():
        acc_ref[...] = jnp.zeros_like(acc_ref)

    acc_ref[...] += jnp.dot(x_ref[...], wt_ref[...],
                            preferred_element_type=jnp.float32)

    @pl.when(k == pl.num_programs(2) - 1)
    def _():
        o_ref[...] = (acc_ref[...] + b_ref[...].astype(jnp.float32)
                      + r_ref[...].astype(jnp.float32)).astype(o_ref.dtype)


def linear(x2d, wt, bias, residual=None, *,
           tm_target=256, tn_target=512, tk_target=512):
    """y = x2d @ wt + bias (+ residual). wt is pre-transposed (K, N), bias (1, N)."""
    m, kdim = x2d.shape
    n = wt.shape[1]
    tm, m_pad = _row_tiles(m, tm_target)
    tn = _pick_lane_tile(n, tn_target)
    tk = _pick_lane_tile(kdim, tk_target)
    xp = _pad_rows_to(x2d, m_pad)
    grid = (m_pad // tm, n // tn, kdim // tk)

    in_specs = [
        pl.BlockSpec((tm, tk), lambda i, j, k: (i, k)),
        pl.BlockSpec((tk, tn), lambda i, j, k: (k, j)),
        pl.BlockSpec((1, tn), lambda i, j, k: (0, j)),
    ]
    args = [xp, wt, bias]
    kernel = _linear_kernel
    if residual is not None:
        in_specs.append(pl.BlockSpec((tm, tn), lambda i, j, k: (i, j)))
        args.append(_pad_rows_to(residual, m_pad))
        kernel = _linear_res_kernel

    out = pl.pallas_call(
        kernel,
        out_shape=jax.ShapeDtypeStruct((m_pad, n), x2d.dtype),
        grid_spec=pltpu.PrefetchScalarGridSpec(
            num_scalar_prefetch=0,
            grid=grid,
            in_specs=in_specs,
            out_specs=pl.BlockSpec((tm, tn), lambda i, j, k: (i, j)),
            scratch_shapes=[pltpu.VMEM((tm, tn), jnp.float32)],
        ),
        compiler_params=pltpu.CompilerParams(
            dimension_semantics=("parallel", "parallel", "arbitrary"),
            vmem_limit_bytes=VMEM_LIMIT),
    )(*args)
    return out[:m]


# ------------------------- fused multi-head attention -----------------------
# Grid over batch; all heads of one batch item are processed per grid step with
# in-VMEM head slicing (no (B,L,H,dh) transposes in HBM) and a single lane-dense
# (Lq, D) context store.  Self-attention emits no attention probabilities at
# all; cross-attention stores only head 0 (the value the module returns).
# TODO(synk): flash-style Lk tiling (online softmax) for very long sequences.

def _self_attn_kernel(qkv_ref, mask_ref, ctx_ref, *, n_head, d_head, scale):
    qkv = qkv_ref[0].astype(jnp.float32)                 # (Lq, 3D)
    d_model = n_head * d_head
    add_mask = mask_ref[0]                               # (Lq, Lq) additive f32
    parts = []
    for h in range(n_head):
        lo = h * d_head
        q = qkv[:, lo:lo + d_head] * scale
        k = qkv[:, d_model + lo:d_model + lo + d_head]
        v = qkv[:, 2 * d_model + lo:2 * d_model + lo + d_head]
        s = jax.lax.dot_general(q, k, (((1,), (1,)), ((), ())),
                                preferred_element_type=jnp.float32) + add_mask
        mx = jnp.max(s, axis=-1, keepdims=True)
        p = jnp.exp(s - mx)
        denom = jnp.sum(p, axis=-1, keepdims=True)
        attn = p * pl.reciprocal(denom, approx=True)
        # TODO(synk): attention-prob dropout is identity in eval mode.
        parts.append(jnp.dot(attn, v, preferred_element_type=jnp.float32))
    ctx_ref[0] = jnp.concatenate(parts, axis=-1).astype(ctx_ref.dtype)


def _cross_attn_kernel(q_ref, kv_ref, mask_ref, ctx_ref, attn_ref,
                       *, n_head, d_head, scale):
    q_all = q_ref[0].astype(jnp.float32)                 # (Lq, D)
    kv = kv_ref[0].astype(jnp.float32)                   # (Lk, 2D)
    d_model = n_head * d_head
    add_mask = mask_ref[0]                               # (Lq, Lk) additive f32
    parts = []
    for h in range(n_head):
        lo = h * d_head
        q = q_all[:, lo:lo + d_head] * scale
        k = kv[:, lo:lo + d_head]
        v = kv[:, d_model + lo:d_model + lo + d_head]
        s = jax.lax.dot_general(q, k, (((1,), (1,)), ((), ())),
                                preferred_element_type=jnp.float32) + add_mask
        mx = jnp.max(s, axis=-1, keepdims=True)
        p = jnp.exp(s - mx)
        denom = jnp.sum(p, axis=-1, keepdims=True)
        attn = p * pl.reciprocal(denom, approx=True)
        if h == 0:                                       # only head-0 probs are used
            attn_ref[0] = attn.astype(attn_ref.dtype)
        parts.append(jnp.dot(attn, v, preferred_element_type=jnp.float32))
    ctx_ref[0] = jnp.concatenate(parts, axis=-1).astype(ctx_ref.dtype)


def self_attention(qkv3, add_mask, n_head):
    """qkv3: (B, Lq, 3D) fused QKV activations; returns ctx (B, Lq, D)."""
    bsz, lq, three_d = qkv3.shape
    d_model = three_d // 3
    dh = d_model // n_head
    kernel = functools.partial(_self_attn_kernel, n_head=n_head, d_head=dh,
                               scale=1.0 / math.sqrt(dh))
    return pl.pallas_call(
        kernel,
        out_shape=jax.ShapeDtypeStruct((bsz, lq, d_model), qkv3.dtype),
        grid_spec=pltpu.PrefetchScalarGridSpec(
            num_scalar_prefetch=0,
            grid=(bsz,),
            in_specs=[
                pl.BlockSpec((1, lq, three_d), lambda b: (b, 0, 0)),
                pl.BlockSpec((1, lq, lq), lambda b: (b, 0, 0)),
            ],
            out_specs=pl.BlockSpec((1, lq, d_model), lambda b: (b, 0, 0)),
        ),
        compiler_params=pltpu.CompilerParams(
            dimension_semantics=("parallel",),
            vmem_limit_bytes=VMEM_LIMIT),
    )(qkv3, add_mask)


def cross_attention(q3, kv3, add_mask, n_head):
    """q3: (B, Lq, D), kv3: (B, Lk, 2D). Returns (ctx (B,Lq,D), attn_head0 (B,Lq,Lk))."""
    bsz, lq, d_model = q3.shape
    lk = kv3.shape[1]
    dh = d_model // n_head
    kernel = functools.partial(_cross_attn_kernel, n_head=n_head, d_head=dh,
                               scale=1.0 / math.sqrt(dh))
    return pl.pallas_call(
        kernel,
        out_shape=(jax.ShapeDtypeStruct((bsz, lq, d_model), q3.dtype),
                   jax.ShapeDtypeStruct((bsz, lq, lk), jnp.float32)),
        grid_spec=pltpu.PrefetchScalarGridSpec(
            num_scalar_prefetch=0,
            grid=(bsz,),
            in_specs=[
                pl.BlockSpec((1, lq, d_model), lambda b: (b, 0, 0)),
                pl.BlockSpec((1, lk, 2 * d_model), lambda b: (b, 0, 0)),
                pl.BlockSpec((1, lq, lk), lambda b: (b, 0, 0)),
            ],
            out_specs=(pl.BlockSpec((1, lq, d_model), lambda b: (b, 0, 0)),
                       pl.BlockSpec((1, lq, lk), lambda b: (b, 0, 0))),
        ),
        compiler_params=pltpu.CompilerParams(
            dimension_semantics=("parallel",),
            vmem_limit_bytes=VMEM_LIMIT),
    )(q3, kv3, add_mask)


# --------------------- fused position-wise feed-forward ---------------------
# LN3 -> W1 -> ReLU -> W2 -> +residual, with d_ff streamed over an inner
# "arbitrary" grid axis (weights never fully resident / double-buffered).

def _ffn_kernel(x_ref, g_ref, b_ref, w1t_ref, b1_ref, w2t_ref, b2_ref,
                o_ref, xn_sc, acc_sc):
    j = pl.program_id(1)

    @pl.when(j == 0)
    def _():
        xn_sc[...] = _layernorm_rows(x_ref[...].astype(jnp.float32),
                                     g_ref[...], b_ref[...])
        acc_sc[...] = jnp.zeros_like(acc_sc)

    h = jnp.dot(xn_sc[...], w1t_ref[...], preferred_element_type=jnp.float32) \
        + b1_ref[...].astype(jnp.float32)
    h = jnp.maximum(h, 0.0)
    # TODO(synk): FFN dropouts are identity in eval mode.
    acc_sc[...] += jnp.dot(h, w2t_ref[...], preferred_element_type=jnp.float32)

    @pl.when(j == pl.num_programs(1) - 1)
    def _():
        o_ref[...] = (acc_sc[...] + b2_ref[...].astype(jnp.float32)
                      + x_ref[...].astype(jnp.float32)).astype(o_ref.dtype)


def pos_ffn(x2d, g, b, w1t, b1, w2t, b2, *, tm_target=256, tdff_target=512):
    m, d = x2d.shape
    dff = w1t.shape[1]
    tm, m_pad = _row_tiles(m, tm_target)
    tdff = _pick_lane_tile(dff, tdff_target)
    xp = _pad_rows_to(x2d, m_pad)
    grid = (m_pad // tm, dff // tdff)

    out = pl.pallas_call(
        _ffn_kernel,
        out_shape=jax.ShapeDtypeStruct((m_pad, d), x2d.dtype),
        grid_spec=pltpu.PrefetchScalarGridSpec(
            num_scalar_prefetch=0,
            grid=grid,
            in_specs=[
                pl.BlockSpec((tm, d), lambda i, j: (i, 0)),
                pl.BlockSpec((1, d), lambda i, j: (0, 0)),
                pl.BlockSpec((1, d), lambda i, j: (0, 0)),
                pl.BlockSpec((d, tdff), lambda i, j: (0, j)),
                pl.BlockSpec((1, tdff), lambda i, j: (0, j)),
                pl.BlockSpec((tdff, d), lambda i, j: (j, 0)),
                pl.BlockSpec((1, d), lambda i, j: (0, 0)),
            ],
            out_specs=pl.BlockSpec((tm, d), lambda i, j: (i, 0)),
            scratch_shapes=[pltpu.VMEM((tm, d), jnp.float32),
                            pltpu.VMEM((tm, d), jnp.float32)],
        ),
        compiler_params=pltpu.CompilerParams(
            dimension_semantics=("parallel", "arbitrary"),
            vmem_limit_bytes=VMEM_LIMIT),
    )(xp, g, b, w1t, b1, w2t, b2)
    return out[:m]


# --------------------------- parameter preparation ---------------------------
# One-time, outside the hot path: transpose weights, concatenate [Wq;Wk;Wv] /
# [Wk;Wv], reshape biases / LN params to (1, N).

def prepare_params(params):
    def vec(x):
        return x.reshape(1, -1)

    slf = params["slf"]
    ctx = params["ctx"]
    return dict(
        n_head=params["n_head"],
        ln1_g=vec(params["ln1_g"]), ln1_b=vec(params["ln1_b"]),
        ln2_g=vec(params["ln2_g"]), ln2_b=vec(params["ln2_b"]),
        ln3_g=vec(params["ln3_g"]), ln3_b=vec(params["ln3_b"]),
        slf=dict(
            WqkvT=jnp.concatenate([slf["Wq"], slf["Wk"], slf["Wv"]], axis=0).T,
            bqkv=vec(jnp.concatenate([slf["bq"], slf["bk"], slf["bv"]])),
            WoT=slf["Wo"].T, bo=vec(slf["bo"]),
        ),
        ctx=dict(
            WqT=ctx["Wq"].T, bq=vec(ctx["bq"]),
            WkvT=jnp.concatenate([ctx["Wk"], ctx["Wv"]], axis=0).T,
            bkv=vec(jnp.concatenate([ctx["bk"], ctx["bv"]])),
            WoT=ctx["Wo"].T, bo=vec(ctx["bo"]),
        ),
        W1T=params["W1"].T, b1=vec(params["b1"]),
        W2T=params["W2"].T, b2=vec(params["b2"]),
    )


def _additive_mask(mask, b, lq, lk):
    # TODO(synk): for causal / padding masks this could be generated in-kernel
    # from broadcasted_iota + SMEM lengths to avoid the O(B*Lq*Lk) HBM array.
    if mask is None:
        return jnp.zeros((b, lq, lk), jnp.float32)
    return jnp.where(mask, jnp.float32(NEG_INF), jnp.float32(0.0)).astype(jnp.float32)


# ----------------------------- full DecoderBlock -----------------------------

def decoder_block_forward(dec_input, enc_output, kp,
                          slf_attn_mask=None, dec_enc_attn_mask=None):
    """Mirrors DecoderBlock.forward (eval mode). Returns (output, attn, all_input).
    `kp` is the kernel-ready parameter dict from prepare_params()."""
    B, Lq, D = dec_input.shape
    _, Lk, _ = enc_output.shape
    H = kp["n_head"]

    dec2d = dec_input.reshape(B * Lq, D)
    enc2d = enc_output.reshape(B * Lk, D)

    # ---- LN1 fused into the QKV projection (q = k = v = input_norm) ----
    qkv2d, all_input2d = ln_linear(dec2d, kp["ln1_g"], kp["ln1_b"],
                                   kp["slf"]["WqkvT"], kp["slf"]["bqkv"],
                                   emit_xn=True)

    # ---- self attention (no attention-prob output) ----
    slf_add = _additive_mask(slf_attn_mask, B, Lq, Lq)
    ctx_s = self_attention(qkv2d.reshape(B, Lq, 3 * D), slf_add, H)
    # dropout(query) is identity in eval; residual "+ dec_input" fused into out-proj
    query2d = linear(ctx_s.reshape(B * Lq, D), kp["slf"]["WoT"], kp["slf"]["bo"],
                     residual=dec2d)

    # ---- LN2 fused into the cross-attention Q projection ----
    q_c2d = ln_linear(query2d, kp["ln2_g"], kp["ln2_b"],
                      kp["ctx"]["WqT"], kp["ctx"]["bq"])
    kv2d = linear(enc2d, kp["ctx"]["WkvT"], kp["ctx"]["bkv"])

    # ---- cross attention (only head-0 probabilities are written) ----
    ctx_add = _additive_mask(dec_enc_attn_mask, B, Lq, Lk)
    ctx_c, attn0 = cross_attention(q_c2d.reshape(B, Lq, D),
                                   kv2d.reshape(B, Lk, 2 * D), ctx_add, H)
    # dropout(mid) identity; residual "+ query" fused into the output projection
    mid_plus_query2d = linear(ctx_c.reshape(B * Lq, D),
                              kp["ctx"]["WoT"], kp["ctx"]["bo"],
                              residual=query2d)

    # ---- position-wise FFN (fused LN3 -> W1 -> ReLU -> W2 -> +residual) ----
    out2d = pos_ffn(mid_plus_query2d, kp["ln3_g"], kp["ln3_b"],
                    kp["W1T"], kp["b1"], kp["W2T"], kp["b2"])

    return (out2d.reshape(B, Lq, D), attn0, all_input2d.reshape(B, Lq, D))


# ------------------------------ pure-JAX reference ---------------------------

def _hmm(a, b):
    return jnp.matmul(a, b, precision=jax.lax.Precision.HIGHEST)


def _ref_layer_norm(x, g, b):
    mean = x.mean(-1, keepdims=True)
    xc = x - mean
    std = jnp.sqrt((xc * xc).sum(-1, keepdims=True) / (x.shape[-1] - 1))
    return g * xc / (std + EPS) + b


def _ref_mha(key, value, query, p, mask, H):
    B, Lq, D = query.shape
    Lk = key.shape[1]
    dh = D // H

    def proj(x, W, b):
        return _hmm(x, W.T) + b

    def shp(x, l):
        return x.reshape(B, l, H, dh).transpose(0, 2, 1, 3)

    k = shp(proj(key, p["Wk"], p["bk"]), Lk)
    v = shp(proj(value, p["Wv"], p["bv"]), Lk)
    q = shp(proj(query, p["Wq"], p["bq"]), Lq) / math.sqrt(dh)
    s = jnp.einsum("bhqd,bhkd->bhqk", q, k, precision=jax.lax.Precision.HIGHEST)
    if mask is not None:
        s = s + jnp.where(mask, NEG_INF, 0.0)[:, None, :, :]
    a = jax.nn.softmax(s, axis=-1)
    ctx = jnp.einsum("bhqk,bhkd->bhqd", a, v,
                     precision=jax.lax.Precision.HIGHEST)
    ctx = ctx.transpose(0, 2, 1, 3).reshape(B, Lq, D)
    return _hmm(ctx, p["Wo"].T) + p["bo"], a[:, 0]


def _ref_decoder_block(dec_input, enc_output, params, slf_mask, ctx_mask):
    H = params["n_head"]
    input_norm = _ref_layer_norm(dec_input, params["ln1_g"], params["ln1_b"])
    all_input = input_norm
    q, _ = _ref_mha(all_input, all_input, input_norm, params["slf"], slf_mask, H)
    query = q + dec_input
    query_norm = _ref_layer_norm(query, params["ln2_g"], params["ln2_b"])
    mid, attn = _ref_mha(enc_output, enc_output, query_norm, params["ctx"], ctx_mask, H)
    x = mid + query
    xn = _ref_layer_norm(x, params["ln3_g"], params["ln3_b"])
    h = jnp.maximum(_hmm(xn, params["W1"].T) + params["b1"], 0.0)
    out = _hmm(h, params["W2"].T) + params["b2"] + x
    return out, attn, all_input


# ----------------------------------- main ------------------------------------

if __name__ == "__main__":
    B, Lq, Lk = 2, 8, 16
    d_model, d_inner, n_head = 32, 64, 4

    key = jax.random.PRNGKey(0)
    keys = jax.random.split(key, 32)
    kit = iter(keys)

    def nrm(shape, scale=0.2):
        return scale * jax.random.normal(next(kit), shape, dtype=jnp.float32)

    def attn_params():
        return dict(Wq=nrm((d_model, d_model)), bq=nrm((d_model,), 0.05),
                    Wk=nrm((d_model, d_model)), bk=nrm((d_model,), 0.05),
                    Wv=nrm((d_model, d_model)), bv=nrm((d_model,), 0.05),
                    Wo=nrm((d_model, d_model)), bo=nrm((d_model,), 0.05))

    params = dict(
        n_head=n_head,
        ln1_g=1.0 + nrm((d_model,), 0.1), ln1_b=nrm((d_model,), 0.1),
        ln2_g=1.0 + nrm((d_model,), 0.1), ln2_b=nrm((d_model,), 0.1),
        ln3_g=1.0 + nrm((d_model,), 0.1), ln3_b=nrm((d_model,), 0.1),
        slf=attn_params(), ctx=attn_params(),
        W1=nrm((d_inner, d_model)), b1=nrm((d_inner,), 0.05),
        W2=nrm((d_model, d_inner)), b2=nrm((d_model,), 0.05),
    )

    dec_input = jax.random.normal(next(kit), (B, Lq, d_model), dtype=jnp.float32)
    enc_output = jax.random.normal(next(kit), (B, Lk, d_model), dtype=jnp.float32)

    # self-attention mask: causal (True = masked out), broadcast over batch
    causal = jnp.triu(jnp.ones((Lq, Lq), dtype=bool), k=1)
    slf_mask = jnp.broadcast_to(causal[None], (B, Lq, Lq))
    # dec->enc mask: pretend last 4 encoder positions of batch item 1 are padding
    ctx_mask = jnp.zeros((B, Lq, Lk), dtype=bool).at[1, :, Lk - 4:].set(True)

    # one-time weight preprocessing (hoisted out of the forward hot path)
    kparams = prepare_params(params)

    out, attn, all_input = decoder_block_forward(
        dec_input, enc_output, kparams,
        slf_attn_mask=slf_mask, dec_enc_attn_mask=ctx_mask)
    out, attn, all_input = jax.block_until_ready((out, attn, all_input))

    ref_out, ref_attn, ref_all = _ref_decoder_block(
        dec_input, enc_output, params, slf_mask, ctx_mask)

    assert out.shape == (B, Lq, d_model)
    assert attn.shape == (B, Lq, Lk)
    assert all_input.shape == (B, Lq, d_model)
    assert jnp.allclose(all_input, ref_all, atol=1e-2, rtol=1e-2), \
        float(jnp.max(jnp.abs(all_input - ref_all)))
    assert jnp.allclose(attn, ref_attn, atol=1e-2, rtol=1e-2), \
        float(jnp.max(jnp.abs(attn - ref_attn)))
    assert jnp.allclose(out, ref_out, atol=2e-2, rtol=2e-2), \
        float(jnp.max(jnp.abs(out - ref_out)))

    print("KERNEL_OK")
</pallas_src>

<mosaic_0001>
module attributes {stable_mosaic.version = 11 : i64} {
  func.func @_ln_linear_xn_kernel(%arg0: i32, %arg1: i32, %arg2: memref<16x32xf32, #tpu.memory_space<vmem>>, %arg3: memref<1x32xf32, #tpu.memory_space<vmem>>, %arg4: memref<1x32xf32, #tpu.memory_space<vmem>>, %arg5: memref<32x96xf32, #tpu.memory_space<vmem>>, %arg6: memref<1x96xf32, #tpu.memory_space<vmem>>, %arg7: memref<16x96xf32, #tpu.memory_space<vmem>>, %arg8: memref<16x32xf32, #tpu.memory_space<vmem>>, %arg9: memref<16x32xf32, #tpu.memory_space<vmem>>) attributes {dimension_semantics = [#tpu.dimension_semantics<parallel>, #tpu.dimension_semantics<arbitrary>], iteration_bounds = array<i64: 1, 1>, scalar_prefetch = 0 : i64, scratch_operands = 1 : i64, tpu.core_type = #tpu.core_type<tc>, window_params = [{transform_indices = @transform_0, window_bounds = array<i64: 16, 32>}, {pipeline_mode = #tpu.pipeline_mode<synchronous>, transform_indices = @transform_1, window_bounds = array<i64: 1, 32>}, {pipeline_mode = #tpu.pipeline_mode<synchronous>, transform_indices = @transform_2, window_bounds = array<i64: 1, 32>}, {transform_indices = @transform_3, window_bounds = array<i64: 32, 96>}, {transform_indices = @transform_4, window_bounds = array<i64: 1, 96>}, {transform_indices = @transform_5, window_bounds = array<i64: 16, 96>}, {transform_indices = @transform_6, window_bounds = array<i64: 16, 32>}]} {
    %c0_i32 = arith.constant 0 : i32
    %0 = arith.cmpi eq, %arg1, %c0_i32 : i32
    %1 = arith.extui %0 : i1 to i32
    %c0_i32_0 = arith.constant 0 : i32
    %2 = arith.cmpi ne, %1, %c0_i32_0 : i32
    scf.if %2 {
      %c0_8 = arith.constant 0 : index
      %c0_9 = arith.constant 0 : index
      %10 = vector.load %arg2[%c0_8, %c0_9] : memref<16x32xf32, #tpu.memory_space<vmem>>, vector<16x32xf32>
      %c0_10 = arith.constant 0 : index
      %c0_11 = arith.constant 0 : index
      %11 = vector.load %arg3[%c0_10, %c0_11] : memref<1x32xf32, #tpu.memory_space<vmem>>, vector<1x32xf32>
      %c0_12 = arith.constant 0 : index
      %c0_13 = arith.constant 0 : index
      %12 = vector.load %arg4[%c0_12, %c0_13] : memref<1x32xf32, #tpu.memory_space<vmem>>, vector<1x32xf32>
      %cst_14 = arith.constant dense<0.000000e+00> : vector<16xf32>
      %13 = vector.multi_reduction <add>, %10, %cst_14 [1] : vector<16x32xf32> to vector<16xf32>
      %14 = vector.shape_cast %13 : vector<16xf32> to vector<16x1xf32>
      %cst_15 = arith.constant 3.200000e+01 : f32
      %15 = vector.broadcast %cst_15 : f32 to vector<16x1xf32>
      %16 = arith.divf %14, %15 : vector<16x1xf32>
      %17 = vector.broadcast %16 : vector<16x1xf32> to vector<16x32xf32>
      %18 = arith.subf %10, %17 : vector<16x32xf32>
      %19 = arith.mulf %18, %18 : vector<16x32xf32>
      %cst_16 = arith.constant dense<0.000000e+00> : vector<16xf32>
      %20 = vector.multi_reduction <add>, %19, %cst_16 [1] : vector<16x32xf32> to vector<16xf32>
      %21 = vector.shape_cast %20 : vector<16xf32> to vector<16x1xf32>
      %cst_17 = arith.constant 3.100000e+01 : f32
      %22 = vector.broadcast %cst_17 : f32 to vector<16x1xf32>
      %23 = arith.divf %21, %22 : vector<16x1xf32>
      %24 = math.sqrt %23 : vector<16x1xf32>
      %cst_18 = arith.constant 9.99999997E-7 : f32
      %25 = vector.broadcast %cst_18 : f32 to vector<16x1xf32>
      %26 = arith.addf %24, %25 : vector<16x1xf32>
      %27 = tpu.reciprocal %26 {approx = true} : vector<16x1xf32> -> vector<16x1xf32>
      %28 = vector.broadcast %11 : vector<1x32xf32> to vector<16x32xf32>
      %29 = arith.mulf %28, %18 : vector<16x32xf32>
      %30 = vector.broadcast %27 : vector<16x1xf32> to vector<16x32xf32>
      %31 = arith.mulf %29, %30 : vector<16x32xf32>
      %32 = vector.broadcast %12 : vector<1x32xf32> to vector<16x32xf32>
      %33 = arith.addf %31, %32 : vector<16x32xf32>
      %c0_19 = arith.constant 0 : index
      %c0_20 = arith.constant 0 : index
      %34 = vector.load %arg9[%c0_19, %c0_20] : memref<16x32xf32, #tpu.memory_space<vmem>>, vector<16x32xf32>
      tpu.vector_store %arg9[%c0_19, %c0_20], %33 {strides = array<i32>} : memref<16x32xf32, #tpu.memory_space<vmem>>, vector<16x32xf32>,
      %c0_21 = arith.constant 0 : index
      %c0_22 = arith.constant 0 : index
      %35 = vector.load %arg8[%c0_21, %c0_22] : memref<16x32xf32, #tpu.memory_space<vmem>>, vector<16x32xf32>
      tpu.vector_store %arg8[%c0_21, %c0_22], %33 {strides = array<i32>} : memref<16x32xf32, #tpu.memory_space<vmem>>, vector<16x32xf32>,
    } else {
    }
    %c0 = arith.constant 0 : index
    %c0_1 = arith.constant 0 : index
    %3 = vector.load %arg9[%c0, %c0_1] : memref<16x32xf32, #tpu.memory_space<vmem>>, vector<16x32xf32>
    %c0_2 = arith.constant 0 : index
    %c0_3 = arith.constant 0 : index
    %4 = vector.load %arg5[%c0_2, %c0_3] : memref<32x96xf32, #tpu.memory_space<vmem>>, vector<32x96xf32>
    %cst = arith.constant dense<0.000000e+00> : vector<16x96xf32>
    %5 = tpu.matmul %3, %4, %cst {dimension_numbers = #tpu.dot_dimension_numbers<[1], [0], [0], [1], [0, 0, 1, 1], [], []>} : vector<16x32xf32>, vector<32x96xf32>, vector<16x96xf32> -> vector<16x96xf32>
    %c0_4 = arith.constant 0 : index
    %c0_5 = arith.constant 0 : index
    %6 = vector.load %arg6[%c0_4, %c0_5] : memref<1x96xf32, #tpu.memory_space<vmem>>, vector<1x96xf32>
    %7 = vector.broadcast %6 : vector<1x96xf32> to vector<16x96xf32>
    %8 = arith.addf %5, %7 : vector<16x96xf32>
    %c0_6 = arith.constant 0 : index
    %c0_7 = arith.constant 0 : index
    %9 = vector.load %arg7[%c0_6, %c0_7] : memref<16x96xf32, #tpu.memory_space<vmem>>, vector<16x96xf32>
    tpu.vector_store %arg7[%c0_6, %c0_7], %8 {strides = array<i32>} : memref<16x96xf32, #tpu.memory_space<vmem>>, vector<16x96xf32>,
    return
  }
  func.func @transform_0(%arg0: i32, %arg1: i32) -> (i32, i32) {
    %c0_i32 = arith.constant 0 : i32
    %c0_i32_0 = arith.constant 0 : i32
    return %arg0, %c0_i32 : i32, i32
  }
  func.func @transform_1(%arg0: i32, %arg1: i32) -> (i32, i32) {
    %c0_i32 = arith.constant 0 : i32
    %c0_i32_0 = arith.constant 0 : i32
    %c0_i32_1 = arith.constant 0 : i32
    return %c0_i32, %c0_i32_0 : i32, i32
  }
  func.func @transform_2(%arg0: i32, %arg1: i32) -> (i32, i32) {
    %c0_i32 = arith.constant 0 : i32
    %c0_i32_0 = arith.constant 0 : i32
    %c0_i32_1 = arith.constant 0 : i32
    return %c0_i32, %c0_i32_0 : i32, i32
  }
  func.func @transform_3(%arg0: i32, %arg1: i32) -> (i32, i32) {
    %c0_i32 = arith.constant 0 : i32
    %c0_i32_0 = arith.constant 0 : i32
    return %c0_i32, %arg1 : i32, i32
  }
  func.func @transform_4(%arg0: i32, %arg1: i32) -> (i32, i32) {
    %c0_i32 = arith.constant 0 : i32
    %c0_i32_0 = arith.constant 0 : i32
    return %c0_i32, %arg1 : i32, i32
  }
  func.func @transform_5(%arg0: i32, %arg1: i32) -> (i32, i32) {
    %c0_i32 = arith.constant 0 : i32
    return %arg0, %arg1 : i32, i32
  }
  func.func @transform_6(%arg0: i32, %arg1: i32) -> (i32, i32) {
    %c0_i32 = arith.constant 0 : i32
    %c0_i32_0 = arith.constant 0 : i32
    return %arg0, %c0_i32 : i32, i32
  }
}

</mosaic_0001>

<bundles_post_ra>
// kernel: tpu_custom_call.1
= control target key start
LH: loop header
LB: loop body
LE: loop exit
PB: predicated region body
PF: predicated region fallthrough
CT: control target
= control target key end

     0   :  { %12 = vsyncpa [#allocation4], 0  ;;  %s492_s0 = inlined_call_operand.hbm [shape: f32[16,32], index: 0, kind: input, shape index: {}]   ;;  %s493_s1 = inlined_call_operand.hbm [shape: f32[1,32], index: 1, kind: input, shape index: {}]   ;;  %s494_s2 = inlined_call_operand.vmem [shape: f32[1,32], index: 2, kind: input, shape index: {}]   ;;  %s495_s3 = inlined_call_operand.hbm [shape: f32[32,96], index: 3, kind: input, shape index: {}]   ;;  %s496_s4 = inlined_call_operand.vmem [shape: f32[1,96], index: 4, kind: input, shape index: {}]   ;;  %s497_s5 = inlined_call_operand.hbm [shape: f32[16,96], index: 5, kind: output, shape index: {0}]   ;;  %s498_s6 = inlined_call_operand.hbm [shape: f32[16,32], index: 6, kind: output, shape index: {1}]  }
   0x1   :  { %13 = vsyncpa [#allocation7], 0 }
   0x2   :  { %14 = vsyncpa [#allocation5], 0  ;;  %s34_s23 = sshll.u32 %s493_s1, 4  ;;  %s35_s23 = int_to_ptr.hbm [resolvable:$true] %s34_s23 }
   0x3   :  { %15 = vsyncpa [#allocation11], 0  ;;  %s395_s24 = smov [#allocation6]   ;;  %s20_s28 = sshll.u32 %s492_s0, 4  ;;  %s21_s28 = int_to_ptr.hbm [resolvable:$true] %s20_s28 }
   0x4   :  { %s36_s25 = sshll.u32 %s395_s24, 4  ;;  %s396_s29 = smov [#allocation3]   ;;  %s37_s25 = int_to_ptr.vmem [resolvable:$true] %s36_s25 }
   0x5   :  { %39 = dma.hbm_to_vmem [thread:$0]  %s35_s23, 16, %s37_s25, [#allocation7]  }
   0x6   :  { %s22_s30 = sshll.u32 %s396_s29, 4  ;;  %s397_s7 = smov 128   ;;  %s23_s30 = int_to_ptr.vmem [resolvable:$true] %s22_s30 }
   0x7   :  { %s398_s8 = smov 8   ;;  %s46_s10 = sshll.u32 %s495_s3, 4  ;;  %s47_s10 = int_to_ptr.hbm [resolvable:$true] %s46_s10 }
   0x8   :  { %28 = dma.hbm_to_vmem [thread:$0]  %s21_s28, 256, %s23_s30, [#allocation4], %s397_s7, %s397_s7, %s398_s8  }
   0x9   :  { %s399_s11 = smov [#allocation8]  }
   0xa   :  { %s48_s12 = sshll.u32 %s399_s11, 4  ;;  %s49_s12 = int_to_ptr.vmem [resolvable:$true] %s48_s12 }
   0xb   :  { %54 = dma.hbm_to_vmem [thread:$0]  %s47_s10, 512, %s49_s12, [#allocation7], %s397_s7, %s397_s7, %s398_s8  }
   0xc   :  { %387 = dma.done.wait [#allocation4], 256  }
   0xd   :  { %388 = vsyncadd [#allocation4], 4294967040 }
   0xe   :  { %389 = dma.done.wait [#allocation7], 528  }
   0xf   :  { %390 = vsyncadd [#allocation7], 4294966768  ;;  %vm77_vm0 = vcmask 261120   ;;  %v73_v0 = vld [vmem:[#allocation3] sm:$0xff]  ;;  %v74_v2 = vld [vmem:[#allocation3 + $0x8] sm:$0xff]  ;;  %v400_v4 = vmov 32.0  }
  0x10   :  { %v78_v1 = vsel %vm77_vm0, %v73_v0, 0.0  ;;  %v81_v3 = vsel %vm77_vm0, %v74_v2, 0.0  ;;  %255 = vrcp.f32 %v400_v4  ;;  %v401_v21 = vmov 31.0   ;;  %v161_v30 = vld [vmem:[#allocation8 + $0x18] sm:$0xff]  ;;  %v160_v32 = vld [vmem:[#allocation8 + $0x10] sm:$0xff]  ;;  %v159_v36 = vld [vmem:[#allocation8 + $0x8] sm:$0xff] }
  0x11   :  { %79 = vadd.xlane.f32.xlu0 %v78_v1  ;;  %257 = vrcp.f32 %v401_v21  ;;  %185 = vmatpush.msra.mxu0 %v161_v30  ;;  %v158_v38 = vld [vmem:[#allocation8] sm:$0xff]  ;;  %v252_v53 = vld [vmem:[#allocation6] ss:$0 sm:$0xff]  ;;  %s218_s16 = sshll.u32 %s498_s6, 4  ;;  %vm196_vm7 = vcmask 785408   ;;  %s403_s19 = smov [#allocation9]   ;;  %s219_s16 = int_to_ptr.hbm [resolvable:$true] %s218_s16 }
  0x12   :  { %239 = vmatpush.msra.mxu1 %v161_v30  ;;  %v253_v58 = vld [vmem:[%s494_s2] ss:$0 sm:$0xff]  ;;  %s402_s2 = smov [#allocation10]   ;;  %s203_s20 = sshll.u32 %s403_s19, 4  ;;  %s204_s20 = int_to_ptr.vmem [resolvable:$true] %s203_s20 }
  0x13   :  { %186 = vmatpush.msra.mxu0 %v160_v32  ;;  %s216_s13 = sshll.u32 %s402_s2, 4  ;;  %s205_s6 = sshll.u32 %s497_s5, 4  ;;  %s217_s13 = int_to_ptr.vmem [resolvable:$true] %s216_s13  ;;  %s206_s6 = int_to_ptr.hbm [resolvable:$true] %s205_s6 }
  0x14   :  { %240 = vmatpush.msra.mxu1 %v160_v32 }
  0x15   :  { %187 = vmatpush.msra.mxu0 %v159_v36 }
  0x16   :  { %v256_v5 = vpop.eup %255  ;;  %241 = vmatpush.msra.mxu1 %v159_v36 }
  0x17   :  { %v85_v6 = vmul.f32 32.0, %v256_v5  ;;  %vm89_vm1 = vweird.f32 %v256_v5  ;;  %v258_v22 = vpop.eup %257  ;;  %188 = vmatpush.msra.mxu0 %v158_v38 }
  0x18   :  { %v104_v23 = vmul.f32 31.0, %v258_v22  ;;  %vm108_vm2 = vweird.f32 %v258_v22  ;;  %242 = vmatpush.msra.mxu1 %v158_v38 }
  0x19   :  { %82 = vadd.xlane.f32.xlu0 %v81_v3  ;;  %v86_v7 = vsub.f32 1.0, %v85_v6  ;;  %v254_v6 = vld [vmem:[%s496_s4] ss:$0 sm:$0xff] }
  0x1a   :  { %v105_v24 = vsub.f32 1.0, %v104_v23 }
  0x1b   :  { %v87_v8 = vmul.f32 %v256_v5, %v86_v7 }
  0x1c   :  { %v106_v25 = vmul.f32 %v258_v22, %v105_v24 }
  0x1d   :  { %v88_v9 = vadd.f32 %v256_v5, %v87_v8 }
  0x1e   :  { %v107_v26 = vadd.f32 %v258_v22, %v106_v25 }
  0x1f   :  { %v90_v10 = vsel %vm89_vm1, %v256_v5, %v88_v9 }
  0x20   :  { %v109_v27 = vsel %vm108_vm2, %v258_v22, %v107_v26 }
  0x84   :  { %v80_v11 = vpop.xlane.xlu0 %79 }
  0x85   :  { %v91_v12 = vmul.f32 %v90_v10, %v80_v11 }
  0x87   :  { %v456_v13 = vsub.f32 %v73_v0, %v91_v12 }
  0x89   :  { %v95_v14 = vmul.f32 %v456_v13, %v456_v13  ;;  %v143_v57 = vmul.f32 %v252_v53, %v456_v13 }
  0x8b   :  { %v97_v15 = vsel %vm77_vm0, %v95_v14, 0.0 }
  0x8c   :  { %98 = vadd.xlane.f32.xlu1 %v97_v15  ;;  %v83_v16 = vpop.xlane.xlu0 %82 }
  0x8d   :  { %v92_v17 = vmul.f32 %v90_v10, %v83_v16 }
  0x8f   :  { %v461_v18 = vsub.f32 %v74_v2, %v92_v17 }
  0x91   :  { %v96_v19 = vmul.f32 %v461_v18, %v461_v18  ;;  %v144_v0 = vmul.f32 %v252_v53, %v461_v18 }
  0x93   :  { %v100_v20 = vsel %vm77_vm0, %v96_v19, 0.0 }
  0x94   :  { %101 = vadd.xlane.f32.xlu1 %v100_v20 }
  0xff   :  { %v99_v28 = vpop.xlane.xlu1 %98 }
 0x100   :  { %v110_v29 = vmul.f32 %v109_v27, %v99_v28 }
 0x102   :  { %259 = vrsqrt.f32 %v110_v29  ;;  %vm119_vm3 = vcmp.eq.f32.partialorder %v110_v29, inf  ;;  %v122_v46 = vand.u32 2147483648, %v110_v29  ;;  %vm121_vm4 = vcmp.eq.f32.partialorder %v110_v29, 0.0 }
 0x107   :  { %v102_v31 = vpop.xlane.xlu1 %101 }
 0x108   :  { %v260_v33 = vpop.eup %259  ;;  %v111_v34 = vmul.f32 %v109_v27, %v102_v31 }
 0x109   :  { %v113_v35 = vmul.f32 %v260_v33, %v110_v29 }
 0x10a   :  { %261 = vrsqrt.f32 %v111_v34  ;;  %vm131_vm5 = vcmp.eq.f32.partialorder %v111_v34, inf  ;;  %v134_v55 = vand.u32 2147483648, %v111_v34  ;;  %vm133_vm6 = vcmp.eq.f32.partialorder %v111_v34, 0.0 }
 0x10b   :  { %v114_v37 = vmul.f32 %v260_v33, %v113_v35 }
 0x10d   :  { %v115_v39 = vmul.f32 0.5, %v114_v37 }
 0x10f   :  { %v116_v40 = vsub.f32 1.5, %v115_v39 }
 0x110   :  { %v262_v41 = vpop.eup %261 }
 0x111   :  { %v117_v42 = vmul.f32 %v260_v33, %v116_v40  ;;  %v125_v43 = vmul.f32 %v262_v41, %v111_v34 }
 0x113   :  { %v118_v44 = vmul.f32 %v117_v42, %v110_v29  ;;  %v126_v45 = vmul.f32 %v262_v41, %v125_v43 }
 0x115   :  { %v120_v47 = vsel %vm119_vm3, %v110_v29, %v118_v44  ;;  %v127_v48 = vmul.f32 0.5, %v126_v45 }
 0x116   :  { %v123_v49 = vsel %vm121_vm4, %v122_v46, %v120_v47 }
 0x117   :  { %v136_v50 = vadd.f32 1e-06, %v123_v49  ;;  %v128_v51 = vsub.f32 1.5, %v127_v48 }
 0x119   :  { %263 = vrcp.f32 %v136_v50  ;;  %v129_v52 = vmul.f32 %v262_v41, %v128_v51 }
 0x11b   :  { %v130_v54 = vmul.f32 %v129_v52, %v111_v34 }
 0x11d   :  { %v132_v56 = vsel %vm131_vm5, %v111_v34, %v130_v54 }
 0x11e   :  { %v135_v59 = vsel %vm133_vm6, %v134_v55, %v132_v56 }
 0x11f   :  { %v264_v60 = vpop.eup %263  ;;  %v137_v61 = vadd.f32 1e-06, %v135_v59 }
 0x120   :  { %v145_v62 = vmul.f32 %v264_v60, %v143_v57 }
 0x121   :  { %265 = vrcp.f32 %v137_v61 }
 0x122   :  { %v150_v63 = vadd.f32 %v253_v58, %v145_v62 }
 0x124   :  { %152 = vst.msk [vmem:[#allocation2] sm:$0xff] %vm77_vm0, %v150_v63 }
 0x125   :  { %154 = vst.msk [vmem:[#allocation10] sm:$0xff] %vm77_vm0, %v150_v63 }
 0x127   :  { %v266_v1 = vpop.eup %265 }
 0x128   :  { %v146_v2 = vmul.f32 %v266_v1, %v144_v0 }
 0x12a   :  { %v151_v3 = vadd.f32 %v253_v58, %v146_v2 }
 0x12b   :  { %v156_v4 = vld [vmem:[#allocation2] sm:$0xff] }
 0x12c   :  { %153 = vst.msk [vmem:[#allocation2 + $0x8] sm:$0xff] %vm77_vm0, %v151_v3  ;;  %237 = vmatmul.msk.f32.vlgmr.msra.gmra.mxu0 %vm77_vm0, %v156_v4 }
 0x12d   :  { %155 = vst.msk [vmem:[#allocation10 + $0x8] sm:$0xff] %vm77_vm0, %v151_v3 }
 0x12e   :  { %224 = dma.vmem_to_hbm [thread:$0]  %s217_s13, 256, %s219_s16, [#allocation11], %s397_s7, %s397_s7, %s398_s8  }
 0x133   :  { %v157_v5 = vld [vmem:[#allocation2 + $0x8] sm:$0xff] }
 0x134   :  { %238 = vmatmul.msk.f32.vlgmr.msra.gmra.mxu1 %vm77_vm0, %v157_v5 }
 0x1a9   :  { %v190_v7 = vpop.f32.mrf.mxu0 }
 0x1aa   :  { %v191_v8 = vadd.f32 %v254_v6, %v190_v7 }
 0x1ac   :  { %197 = vst.msk [vmem:[#allocation9] sm:$0xff] %vm196_vm7, %v191_v8 }
 0x1b1   :  { %v193_v9 = vpop.f32.mrf.mxu1 }
 0x1b2   :  { %v194_v10 = vadd.f32 %v254_v6, %v193_v9 }
 0x1b4   :  { %198 = vst.msk [vmem:[#allocation9 + $0x8] sm:$0xff] %vm196_vm7, %v194_v10 }
 0x1b5   :  { %211 = dma.vmem_to_hbm [thread:$0]  %s204_s20, 256, %s206_s6, [#allocation5], %s397_s7, %s397_s7, %s398_s8  }
 0x1b6   :  { %391 = dma.done.wait [#allocation5], 256  }
 0x1b7   :  { %392 = vsyncadd [#allocation5], 4294967040 }
 0x1b8   :  { %393 = dma.done.wait [#allocation11], 256  }
 0x1b9   :  { %394 = vsyncadd [#allocation11], 4294967040 }
 0x1ba   :  { %233 = vsyncpa [#allocation4], 1 }
 0x1bb   :  { %234 = vsyncpa [#allocation7], 1 }
 0x1bc   :  { %235 = vsyncpa [#allocation5], 1 }
 0x1bd   :  { %236 = vsyncpa [#allocation11], 1 }

</bundles_post_ra>
